<compile_context>
chip_gen: v5e
topology: v5e:2x2
jax: 0.10.0
libtpu: 0.0.40
codegen_flags: <defaults>
</compile_context>

<pallas_src>
import functools

import jax
import jax.numpy as jnp
from jax import lax
from jax.experimental import pallas as pl
from jax.experimental.pallas import tpu as pltpu


# ---------------------------------------------------------------------------
# Kernels
# ---------------------------------------------------------------------------

def _conv_stats_kernel(patches_ref, w_ref, conv_ref, stats_ref,
                       sum_ref, ssq_ref, *, true_p, eps):
    """Pass 1: conv matmul tile + streamed per-channel sum / sumsq.

    patches_ref: (1, K, TP) bf16          w_ref: (Cout_pad, K) bf16
    conv_ref:    (1, Cout_pad, TP) bf16   (raw conv output, bf16 to halve traffic)
    stats_ref:   (1, Cout_pad, 2) f32     ([..,0]=mean, [..,1]=inv_std), last P tile
    sum_ref/ssq_ref: (Cout_pad, 1) f32 VMEM scratch accumulators
    """
    p_idx = pl.program_id(1)
    n_p = pl.num_programs(1)

    @pl.when(p_idx == 0)
    def _init():
        sum_ref[...] = jnp.zeros_like(sum_ref)
        ssq_ref[...] = jnp.zeros_like(ssq_ref)

    # (Cout_pad, K) @ (K, TP) -> (Cout_pad, TP): bf16 MXU, f32 accumulation.
    y = jnp.dot(w_ref[...], patches_ref[0],
                preferred_element_type=jnp.float32)
    conv_ref[0] = y.astype(conv_ref.dtype)

    # Padded patch columns are exactly zero => y is zero there; no mask needed.
    sum_ref[...] += jnp.sum(y, axis=1, keepdims=True)
    ssq_ref[...] += jnp.sum(y * y, axis=1, keepdims=True)

    @pl.when(p_idx == n_p - 1)
    def _finalize():
        inv_p = 1.0 / float(true_p)
        mean = sum_ref[...] * inv_p
        var = jnp.maximum(ssq_ref[...] * inv_p - mean * mean, 0.0)
        stats_ref[0, :, 0:1] = mean
        stats_ref[0, :, 1:2] = lax.rsqrt(var + eps)


def _norm_lrelu_kernel(conv_ref, stats_ref, out_ref, *, slope):
    """Pass 2: instance-norm apply + LeakyReLU, lane-dense over P (f32 math)."""
    y = conv_ref[0].astype(jnp.float32)   # (Cout_pad, TP)
    mean = stats_ref[0, :, 0:1]           # (Cout_pad, 1)
    inv_std = stats_ref[0, :, 1:2]        # (Cout_pad, 1)
    z = (y - mean) * inv_std
    out_ref[0] = jnp.where(z >= 0, z, slope * z).astype(out_ref.dtype)


# ---------------------------------------------------------------------------
# Wrapper
# ---------------------------------------------------------------------------

def _round_up(x, m):
    return (x + m - 1) // m * m


def _vmem_physical_bytes():
    try:
        return int(pltpu.get_tpu_info().vmem_capacity_bytes)
    except Exception:
        return 64 * 1024 * 1024   # conservative (v7x physical VMEM per TC)


def _im2col_reflect_bf16(x, k, stride):
    """x: (N, Cin, H, W) -> patches (N, K, P) bf16, K ordered (cin, kh, kw)."""
    xp = jnp.pad(x.astype(jnp.bfloat16), ((0, 0), (0, 0), (1, 1), (1, 1)),
                 mode="reflect")
    N, C, Hp, Wp = xp.shape
    Ho = (Hp - k) // stride + 1
    Wo = (Wp - k) // stride + 1
    slabs = []
    for kh in range(k):
        for kw in range(k):
            slabs.append(xp[:, :, kh:kh + stride * Ho:stride,
                               kw:kw + stride * Wo:stride])    # (N,C,Ho,Wo)
    p = jnp.stack(slabs, axis=2)                 # (N, C, k*k, Ho, Wo)
    p = p.reshape(N, C * k * k, Ho * Wo)         # (N, K, P); matches weight.reshape
    return p, Ho, Wo


def _choose_tp(K, cout_pad, P, vmem_budget):
    """Largest P tile (multiple of 128, <=2048) whose working set fits budget.

    Prefers a tile that divides P exactly so no pad / final slice is needed.
    """
    def fits(tp):
        # double-buffered bf16 patches + bf16 conv tile, plus resident bf16 weights
        work = 2 * (K * tp * 2 + cout_pad * tp * 2) + K * cout_pad * 2
        return work <= vmem_budget

    cap = 2048
    if P % 128 == 0:
        tp = min(P, cap)
        while tp >= 128:
            if P % tp == 0 and fits(tp):
                return tp
            tp -= 128
    tp = min(_round_up(P, 128), cap)
    while tp > 128 and not fits(tp):
        tp -= 128
    return tp


@functools.partial(jax.jit, static_argnums=(3,))
def block_forward(x, weight, bias, stride):
    """x: (N, Cin, H, W) f32; weight: (Cout, Cin, 4, 4); bias: (Cout,)."""
    del bias  # bias before InstanceNorm2d(affine=False) cancels exactly (no-op).

    k = weight.shape[-1]
    cout = weight.shape[0]
    cin = weight.shape[1]
    N = x.shape[0]

    patches, Ho, Wo = _im2col_reflect_bf16(x, k, stride)       # (N, K, P) bf16
    P = Ho * Wo
    K = cin * k * k
    cout_pad = _round_up(cout, 8)

    phys_vmem = _vmem_physical_bytes()
    # Tile-choice budget: ~40% of physical (v7x ~25 MiB, v5e/v6e ~51 MiB).
    tp_budget = min(int(phys_vmem * 0.4), 64 * 1024 * 1024)
    TP = _choose_tp(K, cout_pad, P, tp_budget)
    P_pad = _round_up(P, TP)
    nP = P_pad // TP

    if P_pad > P:
        patches = jnp.pad(patches, ((0, 0), (0, 0), (0, P_pad - P)))  # bf16 zeros

    w2d = weight.reshape(cout, K)                              # K ordered (cin, kh, kw)
    if cout_pad > cout:
        w2d = jnp.pad(w2d, ((0, cout_pad - cout), (0, 0)))
    w2d = w2d.astype(jnp.bfloat16)

    # Explicit VMEM limit, capped below physical (leave headroom for compiler scratch).
    est = 2 * (K * TP * 2 + cout_pad * TP * 2) + K * cout_pad * 2 + cout_pad * 4 * 4
    vmem_limit = int(min(max(4 * est, 32 * 1024 * 1024), int(phys_vmem * 0.8)))

    # ---- Pass 1: conv matmul + streamed per-(n, channel) sum / sumsq ----
    conv_raw, stats = pl.pallas_call(
        functools.partial(_conv_stats_kernel, true_p=P, eps=1e-5),
        out_shape=(jax.ShapeDtypeStruct((N, cout_pad, P_pad), jnp.bfloat16),
                   jax.ShapeDtypeStruct((N, cout_pad, 2), jnp.float32)),
        grid_spec=pltpu.PrefetchScalarGridSpec(
            num_scalar_prefetch=0,
            grid=(N, nP),
            in_specs=[
                pl.BlockSpec((1, K, TP), lambda n, p: (n, 0, p)),
                pl.BlockSpec((cout_pad, K), lambda n, p: (0, 0)),
            ],
            out_specs=[
                pl.BlockSpec((1, cout_pad, TP), lambda n, p: (n, 0, p)),
                pl.BlockSpec((1, cout_pad, 2), lambda n, p: (n, 0, 0)),
            ],
            scratch_shapes=[
                pltpu.VMEM((cout_pad, 1), jnp.float32),   # running sum
                pltpu.VMEM((cout_pad, 1), jnp.float32),   # running sum of squares
            ]),
        compiler_params=pltpu.CompilerParams(
            dimension_semantics=("parallel", "arbitrary"),
            vmem_limit_bytes=vmem_limit),
    )(patches, w2d)

    # ---- Pass 2: normalize + LeakyReLU (fully parallel over N and P tiles) ----
    out = pl.pallas_call(
        functools.partial(_norm_lrelu_kernel, slope=0.2),
        out_shape=jax.ShapeDtypeStruct((N, cout_pad, P_pad), jnp.float32),
        grid_spec=pltpu.PrefetchScalarGridSpec(
            num_scalar_prefetch=0,
            grid=(N, nP),
            in_specs=[
                pl.BlockSpec((1, cout_pad, TP), lambda n, p: (n, 0, p)),
                pl.BlockSpec((1, cout_pad, 2), lambda n, p: (n, 0, 0)),
            ],
            out_specs=pl.BlockSpec((1, cout_pad, TP), lambda n, p: (n, 0, p))),
        compiler_params=pltpu.CompilerParams(
            dimension_semantics=("parallel", "parallel"),
            vmem_limit_bytes=vmem_limit),
    )(conv_raw, stats)

    # (N, Cout_pad, P_pad) -> (N, Cout, Ho, Wo). When cout_pad==cout and
    # P_pad==P (divisor TP), the slice is an identity and elided by XLA.
    return out[:, :cout, :P].reshape(N, cout, Ho, Wo)


# ---------------------------------------------------------------------------
# Pure-JAX reference (PyTorch semantics, f32 HIGHEST)
# ---------------------------------------------------------------------------

def block_reference(x, weight, bias, stride):
    xp = jnp.pad(x, ((0, 0), (0, 0), (1, 1), (1, 1)), mode="reflect")
    y = lax.conv_general_dilated(
        xp, weight, window_strides=(stride, stride), padding="VALID",
        dimension_numbers=("NCHW", "OIHW", "NCHW"),
        precision=lax.Precision.HIGHEST)
    y = y + bias.reshape(1, -1, 1, 1)
    mean = jnp.mean(y, axis=(2, 3), keepdims=True)
    var = jnp.mean((y - mean) ** 2, axis=(2, 3), keepdims=True)
    y = (y - mean) * lax.rsqrt(var + 1e-5)
    return jnp.where(y >= 0, y, 0.2 * y)


if __name__ == "__main__":
    # Small shapes consistent with the module.
    N, Cin, Cout, H, W, stride = 2, 4, 8, 16, 16, 2

    key = jax.random.PRNGKey(0)
    kx, kw, kb = jax.random.split(key, 3)
    x = jax.random.normal(kx, (N, Cin, H, W), dtype=jnp.float32)
    fan_in = Cin * 4 * 4
    bound = 1.0 / (fan_in ** 0.5)
    weight = jax.random.uniform(kw, (Cout, Cin, 4, 4), jnp.float32,
                                minval=-bound, maxval=bound)
    bias = jax.random.uniform(kb, (Cout,), jnp.float32,
                              minval=-bound, maxval=bound)

    out = block_forward(x, weight, bias, stride)
    out = jax.block_until_ready(out)

    ref = block_reference(x, weight, bias, stride)
    assert out.shape == ref.shape == (N, Cout, H // stride, W // stride)
    # bf16 im2col/MXU/intermediate vs f32-HIGHEST reference -> relaxed tolerance
    # (all stats/normalization math is f32).
    assert jnp.allclose(out, ref, rtol=3e-2, atol=3e-2), "mismatch vs reference"

    print("KERNEL_OK")
</pallas_src>

<mosaic_0001>
module attributes {stable_mosaic.version = 11 : i64} {
  func.func @_conv_stats_kernel(%arg0: i32, %arg1: i32, %arg2: memref<1x64x128xbf16, #tpu.memory_space<vmem>>, %arg3: memref<8x64xbf16, #tpu.memory_space<vmem>>, %arg4: memref<1x8x128xbf16, #tpu.memory_space<vmem>>, %arg5: memref<1x8x2xf32, #tpu.memory_space<vmem>>, %arg6: memref<8x1xf32, #tpu.memory_space<vmem>>, %arg7: memref<8x1xf32, #tpu.memory_space<vmem>>) attributes {dimension_semantics = [#tpu.dimension_semantics<parallel>, #tpu.dimension_semantics<arbitrary>], iteration_bounds = array<i64: 2, 1>, scalar_prefetch = 0 : i64, scratch_operands = 2 : i64, tpu.core_type = #tpu.core_type<tc>, window_params = [{transform_indices = @transform_0, window_bounds = array<i64: 1, 64, 128>}, {pipeline_mode = #tpu.pipeline_mode<synchronous>, transform_indices = @transform_1, window_bounds = array<i64: 8, 64>}, {transform_indices = @transform_2, window_bounds = array<i64: 1, 8, 128>}, {transform_indices = @transform_3, window_bounds = array<i64: 1, 8, 2>}]} {
    %c0_i32 = arith.constant 0 : i32
    %0 = arith.cmpi eq, %arg1, %c0_i32 : i32
    %1 = arith.extui %0 : i1 to i32
    %c0_i32_0 = arith.constant 0 : i32
    %2 = arith.cmpi ne, %1, %c0_i32_0 : i32
    scf.if %2 {
      %cst_20 = arith.constant 0.000000e+00 : f32
      %25 = vector.broadcast %cst_20 : f32 to vector<8x1xf32>
      %c0_21 = arith.constant 0 : index
      %c0_22 = arith.constant 0 : index
      %26 = vector.load %arg6[%c0_21, %c0_22] : memref<8x1xf32, #tpu.memory_space<vmem>>, vector<8x1xf32>
      tpu.vector_store %arg6[%c0_21, %c0_22], %25 {strides = array<i32>} : memref<8x1xf32, #tpu.memory_space<vmem>>, vector<8x1xf32>,
      %cst_23 = arith.constant 0.000000e+00 : f32
      %27 = vector.broadcast %cst_23 : f32 to vector<8x1xf32>
      %c0_24 = arith.constant 0 : index
      %c0_25 = arith.constant 0 : index
      %28 = vector.load %arg7[%c0_24, %c0_25] : memref<8x1xf32, #tpu.memory_space<vmem>>, vector<8x1xf32>
      tpu.vector_store %arg7[%c0_24, %c0_25], %27 {strides = array<i32>} : memref<8x1xf32, #tpu.memory_space<vmem>>, vector<8x1xf32>,
    } else {
    }
    %c0 = arith.constant 0 : index
    %c0_1 = arith.constant 0 : index
    %3 = vector.load %arg3[%c0, %c0_1] : memref<8x64xbf16, #tpu.memory_space<vmem>>, vector<8x64xbf16>
    %c0_2 = arith.constant 0 : index
    %c0_3 = arith.constant 0 : index
    %c0_4 = arith.constant 0 : index
    %4 = vector.load %arg2[%c0_2, %c0_3, %c0_4] : memref<1x64x128xbf16, #tpu.memory_space<vmem>>, vector<1x64x128xbf16>
    %5 = vector.shape_cast %4 : vector<1x64x128xbf16> to vector<64x128xbf16>
    %cst = arith.constant dense<0.000000e+00> : vector<8x128xf32>
    %6 = tpu.matmul %3, %5, %cst {dimension_numbers = #tpu.dot_dimension_numbers<[1], [0], [0], [1], [0, 0, 1, 1], [], []>} : vector<8x64xbf16>, vector<64x128xbf16>, vector<8x128xf32> -> vector<8x128xf32>
    %7 = arith.truncf %6 : vector<8x128xf32> to vector<8x128xbf16>
    %c0_5 = arith.constant 0 : index
    %c0_6 = arith.constant 0 : index
    %c0_7 = arith.constant 0 : index
    %8 = vector.load %arg4[%c0_5, %c0_6, %c0_7] : memref<1x8x128xbf16, #tpu.memory_space<vmem>>, vector<1x8x128xbf16>
    %9 = vector.shape_cast %8 : vector<1x8x128xbf16> to vector<8x128xbf16>
    %10 = vector.shape_cast %7 : vector<8x128xbf16> to vector<1x8x128xbf16>
    tpu.vector_store %arg4[%c0_5, %c0_6, %c0_7], %10 {strides = array<i32>} : memref<1x8x128xbf16, #tpu.memory_space<vmem>>, vector<1x8x128xbf16>,
    %c0_8 = arith.constant 0 : index
    %c0_9 = arith.constant 0 : index
    %11 = vector.load %arg6[%c0_8, %c0_9] : memref<8x1xf32, #tpu.memory_space<vmem>>, vector<8x1xf32>
    %cst_10 = arith.constant dense<0.000000e+00> : vector<8xf32>
    %12 = vector.multi_reduction <add>, %6, %cst_10 [1] : vector<8x128xf32> to vector<8xf32>
    %13 = vector.shape_cast %12 : vector<8xf32> to vector<8x1xf32>
    %14 = arith.addf %11, %13 : vector<8x1xf32>
    %c0_11 = arith.constant 0 : index
    %c0_12 = arith.constant 0 : index
    %15 = vector.load %arg6[%c0_11, %c0_12] : memref<8x1xf32, #tpu.memory_space<vmem>>, vector<8x1xf32>
    tpu.vector_store %arg6[%c0_11, %c0_12], %14 {strides = array<i32>} : memref<8x1xf32, #tpu.memory_space<vmem>>, vector<8x1xf32>,
    %c0_13 = arith.constant 0 : index
    %c0_14 = arith.constant 0 : index
    %16 = vector.load %arg7[%c0_13, %c0_14] : memref<8x1xf32, #tpu.memory_space<vmem>>, vector<8x1xf32>
    %17 = arith.mulf %6, %6 : vector<8x128xf32>
    %cst_15 = arith.constant dense<0.000000e+00> : vector<8xf32>
    %18 = vector.multi_reduction <add>, %17, %cst_15 [1] : vector<8x128xf32> to vector<8xf32>
    %19 = vector.shape_cast %18 : vector<8xf32> to vector<8x1xf32>
    %20 = arith.addf %16, %19 : vector<8x1xf32>
    %c0_16 = arith.constant 0 : index
    %c0_17 = arith.constant 0 : index
    %21 = vector.load %arg7[%c0_16, %c0_17] : memref<8x1xf32, #tpu.memory_space<vmem>>, vector<8x1xf32>
    tpu.vector_store %arg7[%c0_16, %c0_17], %20 {strides = array<i32>} : memref<8x1xf32, #tpu.memory_space<vmem>>, vector<8x1xf32>,
    %c0_i32_18 = arith.constant 0 : i32
    %22 = arith.cmpi eq, %arg1, %c0_i32_18 : i32
    %23 = arith.extui %22 : i1 to i32
    %c0_i32_19 = arith.constant 0 : i32
    %24 = arith.cmpi ne, %23, %c0_i32_19 : i32
    scf.if %24 {
      %c0_20 = arith.constant 0 : index
      %c0_21 = arith.constant 0 : index
      %25 = vector.load %arg6[%c0_20, %c0_21] : memref<8x1xf32, #tpu.memory_space<vmem>>, vector<8x1xf32>
      %cst_22 = arith.constant 1.562500e-02 : f32
      %26 = vector.broadcast %cst_22 : f32 to vector<8x1xf32>
      %27 = arith.mulf %25, %26 : vector<8x1xf32>
      %c0_23 = arith.constant 0 : index
      %c0_24 = arith.constant 0 : index
      %28 = vector.load %arg7[%c0_23, %c0_24] : memref<8x1xf32, #tpu.memory_space<vmem>>, vector<8x1xf32>
      %cst_25 = arith.constant 1.562500e-02 : f32
      %29 = vector.broadcast %cst_25 : f32 to vector<8x1xf32>
      %30 = arith.mulf %28, %29 : vector<8x1xf32>
      %31 = arith.mulf %27, %27 : vector<8x1xf32>
      %32 = arith.subf %30, %31 : vector<8x1xf32>
      %cst_26 = arith.constant 0.000000e+00 : f32
      %33 = vector.broadcast %cst_26 : f32 to vector<8x1xf32>
      %34 = arith.maximumf %32, %33 : vector<8x1xf32>
      %c0_27 = arith.constant 0 : index
      %c0_28 = arith.constant 0 : index
      %c0_29 = arith.constant 0 : index
      %35 = vector.load %arg5[%c0_27, %c0_28, %c0_29] : memref<1x8x2xf32, #tpu.memory_space<vmem>>, vector<1x8x1xf32>
      %36 = vector.shape_cast %35 : vector<1x8x1xf32> to vector<8x1xf32>
      %37 = vector.shape_cast %27 : vector<8x1xf32> to vector<1x8x1xf32>
      tpu.vector_store %arg5[%c0_27, %c0_28, %c0_29], %37 {strides = array<i32>} : memref<1x8x2xf32, #tpu.memory_space<vmem>>, vector<1x8x1xf32>,
      %cst_30 = arith.constant 9.99999974E-6 : f32
      %38 = vector.broadcast %cst_30 : f32 to vector<8x1xf32>
      %39 = arith.addf %34, %38 : vector<8x1xf32>
      %40 = math.rsqrt %39 : vector<8x1xf32>
      %c0_31 = arith.constant 0 : index
      %c0_32 = arith.constant 0 : index
      %c1 = arith.constant 1 : index
      %41 = vector.load %arg5[%c0_31, %c0_32, %c1] : memref<1x8x2xf32, #tpu.memory_space<vmem>>, vector<1x8x1xf32>
      %42 = vector.shape_cast %41 : vector<1x8x1xf32> to vector<8x1xf32>
      %43 = vector.shape_cast %40 : vector<8x1xf32> to vector<1x8x1xf32>
      tpu.vector_store %arg5[%c0_31, %c0_32, %c1], %43 {strides = array<i32>} : memref<1x8x2xf32, #tpu.memory_space<vmem>>, vector<1x8x1xf32>,
    } else {
    }
    return
  }
  func.func @transform_0(%arg0: i32, %arg1: i32) -> (i32, i32, i32) {
    %c0_i32 = arith.constant 0 : i32
    %c0_i32_0 = arith.constant 0 : i32
    return %arg0, %c0_i32, %arg1 : i32, i32, i32
  }
  func.func @transform_1(%arg0: i32, %arg1: i32) -> (i32, i32) {
    %c0_i32 = arith.constant 0 : i32
    %c0_i32_0 = arith.constant 0 : i32
    %c0_i32_1 = arith.constant 0 : i32
    return %c0_i32, %c0_i32_0 : i32, i32
  }
  func.func @transform_2(%arg0: i32, %arg1: i32) -> (i32, i32, i32) {
    %c0_i32 = arith.constant 0 : i32
    %c0_i32_0 = arith.constant 0 : i32
    return %arg0, %c0_i32, %arg1 : i32, i32, i32
  }
  func.func @transform_3(%arg0: i32, %arg1: i32) -> (i32, i32, i32) {
    %c0_i32 = arith.constant 0 : i32
    %c0_i32_0 = arith.constant 0 : i32
    %c0_i32_1 = arith.constant 0 : i32
    return %arg0, %c0_i32, %c0_i32_0 : i32, i32, i32
  }
}

module attributes {stable_mosaic.version = 11 : i64} {
  func.func @_norm_lrelu_kernel(%arg0: i32, %arg1: i32, %arg2: memref<1x8x128xbf16, #tpu.memory_space<vmem>>, %arg3: memref<1x8x2xf32, #tpu.memory_space<vmem>>, %arg4: memref<1x8x128xf32, #tpu.memory_space<vmem>>) attributes {dimension_semantics = [#tpu.dimension_semantics<parallel>, #tpu.dimension_semantics<parallel>], iteration_bounds = array<i64: 2, 1>, scalar_prefetch = 0 : i64, scratch_operands = 0 : i64, tpu.core_type = #tpu.core_type<tc>, window_params = [{transform_indices = @transform_0, window_bounds = array<i64: 1, 8, 128>}, {transform_indices = @transform_1, window_bounds = array<i64: 1, 8, 2>}, {transform_indices = @transform_2, window_bounds = array<i64: 1, 8, 128>}]} {
    %c0 = arith.constant 0 : index
    %c0_0 = arith.constant 0 : index
    %c0_1 = arith.constant 0 : index
    %0 = vector.load %arg2[%c0, %c0_0, %c0_1] : memref<1x8x128xbf16, #tpu.memory_space<vmem>>, vector<1x8x128xbf16>
    %1 = vector.shape_cast %0 : vector<1x8x128xbf16> to vector<8x128xbf16>
    %2 = arith.extf %1 : vector<8x128xbf16> to vector<8x128xf32>
    %c0_2 = arith.constant 0 : index
    %c0_3 = arith.constant 0 : index
    %c0_4 = arith.constant 0 : index
    %3 = vector.load %arg3[%c0_2, %c0_3, %c0_4] : memref<1x8x2xf32, #tpu.memory_space<vmem>>, vector<1x8x1xf32>
    %4 = vector.shape_cast %3 : vector<1x8x1xf32> to vector<8x1xf32>
    %c0_5 = arith.constant 0 : index
    %c0_6 = arith.constant 0 : index
    %c1 = arith.constant 1 : index
    %5 = vector.load %arg3[%c0_5, %c0_6, %c1] : memref<1x8x2xf32, #tpu.memory_space<vmem>>, vector<1x8x1xf32>
    %6 = vector.shape_cast %5 : vector<1x8x1xf32> to vector<8x1xf32>
    %7 = vector.broadcast %4 : vector<8x1xf32> to vector<8x128xf32>
    %8 = arith.subf %2, %7 : vector<8x128xf32>
    %9 = vector.broadcast %6 : vector<8x1xf32> to vector<8x128xf32>
    %10 = arith.mulf %8, %9 : vector<8x128xf32>
    %cst = arith.constant 0.000000e+00 : f32
    %11 = vector.broadcast %cst : f32 to vector<8x128xf32>
    %12 = arith.cmpf oge, %10, %11 : vector<8x128xf32>
    %cst_7 = arith.constant 2.000000e-01 : f32
    %13 = vector.broadcast %cst_7 : f32 to vector<8x128xf32>
    %14 = arith.mulf %13, %10 : vector<8x128xf32>
    %15 = arith.select %12, %10, %14 : vector<8x128xi1>, vector<8x128xf32>
    %c0_8 = arith.constant 0 : index
    %c0_9 = arith.constant 0 : index
    %c0_10 = arith.constant 0 : index
    %16 = vector.load %arg4[%c0_8, %c0_9, %c0_10] : memref<1x8x128xf32, #tpu.memory_space<vmem>>, vector<1x8x128xf32>
    %17 = vector.shape_cast %16 : vector<1x8x128xf32> to vector<8x128xf32>
    %18 = vector.shape_cast %15 : vector<8x128xf32> to vector<1x8x128xf32>
    tpu.vector_store %arg4[%c0_8, %c0_9, %c0_10], %18 {strides = array<i32>} : memref<1x8x128xf32, #tpu.memory_space<vmem>>, vector<1x8x128xf32>,
    return
  }
  func.func @transform_0(%arg0: i32, %arg1: i32) -> (i32, i32, i32) {
    %c0_i32 = arith.constant 0 : i32
    %c0_i32_0 = arith.constant 0 : i32
    return %arg0, %c0_i32, %arg1 : i32, i32, i32
  }
  func.func @transform_1(%arg0: i32, %arg1: i32) -> (i32, i32, i32) {
    %c0_i32 = arith.constant 0 : i32
    %c0_i32_0 = arith.constant 0 : i32
    %c0_i32_1 = arith.constant 0 : i32
    return %arg0, %c0_i32, %c0_i32_0 : i32, i32, i32
  }
  func.func @transform_2(%arg0: i32, %arg1: i32) -> (i32, i32, i32) {
    %c0_i32 = arith.constant 0 : i32
    %c0_i32_0 = arith.constant 0 : i32
    return %arg0, %c0_i32, %arg1 : i32, i32, i32
  }
}

</mosaic_0001>

<bundles_post_ra>
// kernel: block_forward.3
= control target key start
LH: loop header
LB: loop body
LE: loop exit
PB: predicated region body
PF: predicated region fallthrough
CT: control target
= control target key end

     0   :  { %s370_s9 = smov 0   ;;  %s372_s10 = smov 0   ;;  %s406_s0 = inlined_call_operand.vmem [shape: bf16[2,8,128], index: 0, kind: input, shape index: {}]   ;;  %s407_s1 = inlined_call_operand.vmem [shape: f32[2,8,2], index: 1, kind: input, shape index: {}]   ;;  %s408_s2 = inlined_call_operand.vmem [shape: f32[2,8,128], index: 2, kind: output, shape index: {}]  }
   0x1   :  { %s374_s11 = smov 0  }
   0x2 LB: > { %s24_s12 = sadd.s32 1, %s347_s10  ;;  %p295_p0 = scmp.ge.s32.totalorder %s351_s11, 1  ;;  %s351_s11 = sphi %s374_s11, %s12_s11   ;;  %s347_s10 = sphi %s372_s10, %s410_s10   ;;  %s343_s9 = sphi %s370_s9, %s409_s9  }
   0x3   : > { %p26_p1 = scmp.ge.s32.totalorder %s24_s12, 2  ;;  %p139_p2 = scmp.lt.s32.totalorder %s351_s11, 3 }
   0x5   : > { %s412_s12 = smov (%p26_p1, %s24_s12), 0  ;;  %p140_p3 = pnand %p295_p0, %p139_p2 }
   0x6   : > { %p169_p4 = scmp.lt.s32.totalorder (!%p140_p3), %s343_s9, 1 }
   0x7   : > { %143 = sbr.rel (%p140_p3) target bundleno = 146 (0x92), region = 28 }
   0xc   : > { %v353_v0 = vmov 0   ;;  %s414_s9 = smov (!%p169_p4, %s343_s9), 1  ;;  %v354_v2 = vmov 1  }
   0xd   : > { %327 = vset.pattern.permute.xlu0 %v353_v0  ;;  %s297_s13 = sshll.u32 %s414_s9, 3  ;;  %s296_s17 = sshll.u32 %s414_s9, 2 }
   0xe   : > { %s179_s16 = scalar_lea.vmem %s407_s1, %s297_s13  ;;  %s175_s20 = scalar_lea.vmem %s406_s0, %s296_s17 }
   0xf   : > { %v189_v1 = vld [vmem:[%s179_s16] sm:$0xff]  ;;  %s186_s23 = scalar_lea.vmem %s408_s2, %s297_s13 }
  0x10   : > { %192 = vperm.xlu0 %327, %v189_v1   ;;  %v187_v4 = vld [vmem:[%s175_s20] sm:$0xf] }
  0x11   : > { %v188_v5 = vunpack.c.l.bf16 %v187_v4 }
  0x18   : > { %328 = vset.pattern.permute.xlu0 %v354_v2 }
  0x19   : > { %197 = vperm.xlu0 %328, %v189_v1  }
  0x82   : > { %v193_v3 = vpop.permute.xlu0 %192 }
  0x83   : > { %v195_v6 = vsub.f32 %v188_v5, %v193_v3 }
  0x8b   : > { %v198_v7 = vpop.permute.xlu0 %197 }
  0x8c   : > { %v200_v8 = vmul.f32 %v198_v7, %v195_v6 }
  0x8e   : > { %vm201_vm0 = vcmp.ge.f32.partialorder %v200_v8, 0.0  ;;  %v202_v9 = vmul.f32 0.2, %v200_v8 }
  0x90   : > { %v203_v10 = vsel %vm201_vm0, %v200_v8, %v202_v9 }
  0x91   : > { %204 = vst [vmem:[%s186_s23] sm:$0xff] %v203_v10 }
  0x92 PF: > { %s12_s11 = sadd.s32 1, %s351_s11   ;;  %s409_s9 = smov %s347_s10 }
  0x93   : > { %p9_p5 = scmp.ge.s32.totalorder %s12_s11, 4   ;;  %s410_s10 = smov %s412_s12 }
  0x95   :  { %11 = sbr.rel (!%p9_p5) target bundleno = 2 (0x2), region = 61 }

// kernel: block_forward.2
= control target key start
LH: loop header
LB: loop body
LE: loop exit
PB: predicated region body
PF: predicated region fallthrough
CT: control target
= control target key end

     0   :  { %s526_s12 = smov 0   ;;  %s528_s13 = smov 0   ;;  %s575_s0 = inlined_call_operand.vmem [shape: bf16[2,64,128], index: 0, kind: input, shape index: {}]   ;;  %s576_s1 = inlined_call_operand.vmem [shape: bf16[8,64], index: 1, kind: input, shape index: {}]   ;;  %s577_s2 = inlined_call_operand.vmem [shape: bf16[2,8,128], index: 2, kind: output, shape index: {0}]   ;;  %s578_s3 = inlined_call_operand.vmem [shape: f32[2,8,2], index: 3, kind: output, shape index: {1}]  }
   0x1   :  { %s530_s14 = smov 0  }
   0x2 LB: > { %s26_s15 = sadd.s32 1, %s498_s13  ;;  %p423_p0 = scmp.ge.s32.totalorder %s502_s14, 1  ;;  %s502_s14 = sphi %s530_s14, %s14_s14   ;;  %s498_s13 = sphi %s528_s13, %s580_s13   ;;  %s494_s12 = sphi %s526_s12, %s579_s12  }
   0x3   : > { %p28_p1 = scmp.ge.s32.totalorder %s26_s15, 2  ;;  %p159_p2 = scmp.lt.s32.totalorder %s502_s14, 3 }
   0x5   : > { %s582_s15 = smov (%p28_p1, %s26_s15), 0  ;;  %p160_p3 = pnand %p423_p0, %p159_p2 }
   0x6   : > { %p192_p4 = scmp.lt.s32.totalorder (!%p160_p3), %s494_s12, 1  ;;  %s505_s30 = smov (!%p160_p3), 1  }
   0x7   : > { %163 = sbr.rel (%p160_p3) target bundleno = 433 (0x1b1), region = 28 }
   0xc   : > { %s584_s12 = smov (!%p192_p4, %s494_s12), 1  ;;  %v219_v4 = vld [vmem:[%s576_s1] sm:$0xf]  ;;  %vm252_vm0 = vcmask 523264   ;;  %vm216_vm1 = vcmask 7168   ;;  %v504_v5 = vmov 0.0  }
   0xd   : > { %s447_s16 = sshll.u32 %s584_s12, 5  ;;  %217 = vst.msk [vmem:[#allocation2] sm:$0xff] %vm216_vm1, %v504_v5  ;;  %s426_s22 = sshll.u32 %s584_s12, 2  ;;  %vm309_vm5 = vcmask 15368  }
   0xe   : > { %s199_s19 = scalar_lea.vmem %s575_s0, %s447_s16  ;;  %218 = vst.msk [vmem:[#allocation3] sm:$0xff] %vm216_vm1, %v504_v5  ;;  %s206_s25 = scalar_lea.vmem %s577_s2, %s426_s22 }
   0xf   : > { %v451_v0 = vld [vmem:[%s199_s19 + $0x18] sm:$0xff]  ;;  %v450_v1 = vld [vmem:[%s199_s19 + $0x10] sm:$0xff]  ;;  %v449_v2 = vld [vmem:[%s199_s19 + $0x8] sm:$0xff]  ;;  %s427_s26 = sshll.u32 %s584_s12, 3 }
  0x10   : > { %260 = vmatpush.bf16.msra.mxu0 %v451_v0  ;;  %v448_v3 = vld [vmem:[%s199_s19] sm:$0xff]  ;;  %s210_s29 = scalar_lea.vmem %s578_s3, %s427_s26 }
  0x14   : > { %261 = vmatpush.bf16.msra.mxu0 %v450_v1  ;;  %v271_v10 = vld [vmem:[#allocation2] sm:$0xff] }
  0x15   : > { %v277_v13 = vld [vmem:[#allocation3] sm:$0xff] }
  0x18   : > { %262 = vmatpush.bf16.msra.mxu0 %v449_v2 }
  0x1c   : > { %263 = vmatpush.bf16.msra.mxu0 %v448_v3 }
  0x1f   : > { %444 = vmatmul.msk.bf16.vlgmr.msra.gmra.mxu0 %vm252_vm0, %v219_v4 }
  0x9c   : > { %v265_v6 = vpop.f32.mrf.mxu0 }
  0x9d   : > { %v269_v7 = vpack.c.bf16 %v265_v6, %v265_v6  ;;  %272 = vadd.xlane.f32.xlu0 %v265_v6  ;;  %v278_v8 = vmul.f32 %v265_v6, %v265_v6 }
  0x9f   : > { %270 = vst [vmem:[%s206_s25] sm:$0xf] %v269_v7 }
  0xa4   : > { %v267_v9 = vpop.f32.mrf.mxu0 }
  0xa5   : > { %279 = vadd.xlane.f32.xlu0 %v278_v8 }
 0x110   : > { %v273_v11 = vpop.xlane.xlu0 %272 }
 0x111   : > { %v274_v12 = vadd.f32 %v273_v11, %v271_v10 }
 0x113   : > { %276 = vst.msk [vmem:[#allocation2] sm:$0xff] %vm216_vm1, %v274_v12 }
 0x118   : > { %v280_v14 = vpop.xlane.xlu0 %279 }
 0x119   : > { %v281_v15 = vadd.f32 %v280_v14, %v277_v13 }
 0x11a   : > { %v286_v16 = vld [vmem:[#allocation2] sm:$0xff] }
 0x11b   : > { %282 = vst.msk [vmem:[#allocation3] sm:$0xff] %vm216_vm1, %v281_v15  ;;  %v287_v17 = vmul.f32 0.015625, %v286_v16 }
 0x11d   : > { %293 = vst.msk [vmem:[%s210_s29] sm:$0xff] %vm216_vm1, %v287_v17  ;;  %v290_v20 = vmul.f32 %v287_v17, %v287_v17 }
 0x122   : > { %v288_v18 = vld [vmem:[#allocation3] sm:$0xff] }
 0x123   : > { %v289_v19 = vmul.f32 0.015625, %v288_v18 }
 0x125   : > { %v291_v21 = vsub.f32 %v289_v19, %v290_v20 }
 0x127   : > { %v292_v22 = vmax.f32 %v291_v21, 0.0 }
 0x129   : > { %v294_v23 = vadd.f32 1e-05, %v292_v22 }
 0x12b   : > { %478 = vrsqrt.f32 %v294_v23  ;;  %vm301_vm3 = vweird.f32 %v294_v23 }
 0x131   : > { %v479_v24 = vpop.eup %478 }
 0x132   : > { %v296_v25 = vmul.f32 %v479_v24, %v294_v23  ;;  %vm302_vm2 = vweird.f32 %v479_v24 }
 0x133   : > { %vm303_vm4 = vmor %vm301_vm3, %vm302_vm2 }
 0x134   : > { %v297_v26 = vmul.f32 %v479_v24, %v296_v25 }
 0x136   : > { %v298_v27 = vmul.f32 0.5, %v297_v26 }
 0x138   : > { %v299_v28 = vsub.f32 1.5, %v298_v27 }
 0x13a   : > { %v300_v29 = vmul.f32 %v479_v24, %v299_v28 }
 0x13c   : > { %v304_v30 = vsel %vm303_vm4, %v479_v24, %v300_v29 }
 0x13d   : > { %306 = vrot.lane.b32.xlu1 %v304_v30, %s505_s30 }
 0x1af   : > { %v307_v31 = vpop.permute.xlu1 %306 }
 0x1b0   : > { %310 = vst.msk [vmem:[%s210_s29] sm:$0xff] %vm309_vm5, %v307_v31 }
 0x1b1 PF: > { %s14_s14 = sadd.s32 1, %s502_s14   ;;  %s579_s12 = smov %s498_s13 }
 0x1b2   : > { %p11_p5 = scmp.ge.s32.totalorder %s14_s14, 4   ;;  %s580_s13 = smov %s582_s15 }
 0x1b4   :  { %13 = sbr.rel (!%p11_p5) target bundleno = 2 (0x2), region = 78 }

</bundles_post_ra>
